<compile_context>
chip_gen: v7x
topology: tpu7x:2x2x1
jax: 0.10.0
libtpu: 0.0.40
codegen_flags: <defaults>
</compile_context>

<pallas_src>
import math

import jax
import jax.numpy as jnp
import numpy as np
from jax.experimental import pallas as pl
from jax.experimental.pallas import tpu as pltpu


def _round_up(x, m):
    return ((x + m - 1) // m) * m


def _device_kind():
    try:
        return jax.devices()[0].device_kind.lower()
    except Exception:
        return ""


# ------------------------------ Pallas kernel --------------------------------

def tfidf_proj_kernel(tf_ref, w_ref, b_ref, out_ref):
    """Tiled (tf * idf) @ W + b with idf pre-folded into W.

    Grid axes: (i over B tiles, j over D tiles, k over V tiles).  The output
    block depends only on (i, j), so it stays VMEM-resident across the k
    reduction and doubles as the f32 accumulator (no scratch, no epilogue).
    """
    k = pl.program_id(2)

    @pl.when(k == 0)
    def _():
        # Seed the resident output block with the (broadcast) bias.
        out_ref[...] = jnp.broadcast_to(b_ref[...], out_ref.shape)

    # tf streamed f32, cast to bf16 in-register; W streamed bf16.
    # Native bf16 x bf16 MXU matmul with f32 accumulation into the output.
    out_ref[...] += jnp.dot(tf_ref[...].astype(jnp.bfloat16), w_ref[...],
                            preferred_element_type=jnp.float32)


# ------------------------------ Model factory ---------------------------------

def make_idf_vectorizer(idf_vector, w, b, *, w_vmem_budget_bytes=None):
    """Fold idf into W, cast/pad ONCE, and return a jitted
    apply(tf_vectors [B, V] f32) -> (features [B, 1, D] f32,
                                     padding_mask [B, 1, 1, 1] f32)."""
    idf_vector = jnp.asarray(idf_vector, jnp.float32)
    w = jnp.asarray(w, jnp.float32)
    b = jnp.asarray(b, jnp.float32)
    V, D = w.shape

    kind = _device_kind()
    # Per-generation budget for the double-buffered W tile (review guidance).
    if w_vmem_budget_bytes is None:
        w_vmem_budget_bytes = (12 << 20) if "v5" in kind else (24 << 20)

    D_pad = _round_up(D, 128)

    # TD: full output width (contiguous W tiles); split into 2 tiles on
    # 2-TensorCore chips (v7x) so megacore sharding engages on a parallel axis.
    d_tiles = 2 if ("v7" in kind and D_pad % 256 == 0) else 1
    TD = D_pad // d_tiles

    # TK: largest 128-multiple whose double-buffered bf16 W tile fits budget,
    # clamped to [128, 8192]; V is padded up to a multiple of TK.
    tk_cap = w_vmem_budget_bytes // (2 * TD * 2)           # 2 bufs x bf16
    TK = max(128, min(8192, (tk_cap // 128) * 128))
    v_min = _round_up(V, 128)
    if v_min <= TK:
        TK = v_min                                         # single reduction step
    V_pad = _round_up(V, TK)

    # Fold idf into W once: (tf * idf) @ W == tf @ (diag(idf) @ W).
    # Cached bf16 + zero-padded; zero padding keeps the math exact.
    w_scaled = (idf_vector[:, None] * w).astype(jnp.bfloat16)
    w_p = jnp.zeros((V_pad, D_pad), jnp.bfloat16).at[:V, :D].set(w_scaled)
    b_p = jnp.zeros((1, D_pad), jnp.float32).at[0, :D].set(b)

    def _apply(tf_vectors, w_pad, b_pad):
        B = tf_vectors.shape[0]
        TB = min(_round_up(max(B, 8), 8), 128)             # f32 tf: 8-sublane native
        B_pad = _round_up(B, TB)

        tf_p = jnp.zeros((B_pad, V_pad), jnp.float32).at[:B, :V].set(
            tf_vectors.astype(jnp.float32))

        grid = (B_pad // TB, d_tiles, V_pad // TK)

        # Explicit scoped-VMEM limit from the real (double-buffered) block
        # footprint + headroom; stays well under v7x's 64 MiB physical VMEM.
        blk_bytes = 2 * (TK * TD * 2 + TB * TK * 4 + TB * TD * 4 + TD * 4)
        vmem_limit = int(min(max(blk_bytes + (4 << 20), 16 << 20), 40 << 20))

        cost = pl.CostEstimate(
            flops=2 * B_pad * V_pad * D_pad,
            transcendentals=0,
            bytes_accessed=(V_pad * D_pad * 2          # W (bf16) -- dominant
                            + B_pad * V_pad * 4        # tf (f32)
                            + B_pad * D_pad * 4))      # out (f32)

        feat_p = pl.pallas_call(
            tfidf_proj_kernel,
            out_shape=jax.ShapeDtypeStruct((B_pad, D_pad), jnp.float32),
            grid_spec=pltpu.PrefetchScalarGridSpec(
                num_scalar_prefetch=0,
                grid=grid,
                in_specs=[
                    pl.BlockSpec((TB, TK), lambda i, j, k: (i, k)),  # tf (f32)
                    pl.BlockSpec((TK, TD), lambda i, j, k: (k, j)),  # idf-folded W (bf16)
                    pl.BlockSpec((1, TD), lambda i, j, k: (0, j)),   # bias (f32)
                ],
                out_specs=pl.BlockSpec((TB, TD), lambda i, j, k: (i, j)),
            ),
            compiler_params=pltpu.CompilerParams(
                dimension_semantics=("parallel", "parallel", "arbitrary"),
                vmem_limit_bytes=vmem_limit),
            cost_estimate=cost,
        )(tf_p, w_pad, b_pad)

        features = feat_p[:B, :D].reshape(B, 1, D)          # .unsqueeze(1)

        # TODO(synk): generate_padding_mask is not defined in the reference
        # file; we treat a position as padding iff its tf row is all zero
        # (empty text) and use the additive -1e4 / 0 convention.  The mask is
        # derived from the tf inputs (per review), not the post-bias features,
        # and is O(B) work so it stays in plain JAX.
        row_sum = jnp.sum(tf_vectors, axis=-1)               # [B]
        padding_mask = jnp.where(row_sum == 0.0, jnp.float32(-1e4),
                                 jnp.float32(0.0)).reshape(B, 1, 1, 1)
        return features, padding_mask

    apply_jit = jax.jit(_apply)

    def apply(tf_vectors):
        return apply_jit(tf_vectors, w_p, b_p)

    return apply


# ----------------------- host-side (string) preprocessing ---------------------

def compute_idf_vector(vocab, word_count):
    idf = np.zeros(len(vocab), dtype=np.float32)
    for i, word in enumerate(vocab):
        if word in word_count:
            idf[i] = math.log(len(word_count) / word_count[word])
    return idf


def compute_tf_vector(input_text, vocab):
    tf = np.zeros(len(vocab), dtype=np.float32)
    words = input_text.split()
    total_words = len(words)
    for word in words:
        word = word.lower()
        if word in vocab:
            tf[vocab.index(word)] += 1
        else:
            tf[vocab.index('[unknown]')] += 1
    return tf / total_words


if __name__ == "__main__":
    # Small deterministic config: vocab of 16, d_model=32, batch of 2 texts.
    vocab = ['the', 'cat', 'sat', 'on', 'mat', 'dog', 'ran', 'fast',
             'a', 'red', 'blue', 'sky', 'sun', 'moon', 'star', '[unknown]']
    word_count = {'the': 10, 'cat': 3, 'sat': 2, 'on': 8, 'mat': 1,
                  'dog': 4, 'ran': 2, 'fast': 3, 'a': 12, 'sky': 5,
                  'sun': 6, 'moon': 2}
    d_model = 32
    V = len(vocab)

    input_texts = [
        "the cat sat on the mat under the sun",
        "a dog ran fast toward the blue sky",
    ]
    B = len(input_texts)

    # Host-side tf/idf vectors (string processing, not a TPU op).
    idf_vector = jnp.asarray(compute_idf_vector(vocab, word_count))
    tf_vectors = jnp.stack(
        [jnp.asarray(compute_tf_vector(t, vocab)) for t in input_texts], axis=0)

    # Deterministic synthetic Linear(V, d_model) parameters (torch-style uniform).
    key = jax.random.PRNGKey(0)
    kw, kb = jax.random.split(key)
    bound = 1.0 / math.sqrt(V)
    w_t = jax.random.uniform(kw, (d_model, V), jnp.float32, -bound, bound)  # torch [D,V]
    b = jax.random.uniform(kb, (d_model,), jnp.float32, -bound, bound)
    w = w_t.T  # kernel layout [V, D]

    # Build once (weight fold/cast/pad cached), then apply.
    vectorizer = make_idf_vectorizer(idf_vector, w, b)
    features, padding_mask = vectorizer(tf_vectors)
    jax.block_until_ready((features, padding_mask))

    assert features.shape == (B, 1, d_model)
    assert padding_mask.shape == (B, 1, 1, 1)

    # Reference 1: same operand precision as the kernel (f32 tf cast to bf16 in
    # the MXU, bf16-stored idf-folded W, f32 accumulation) -- tight check.
    w_scaled_bf = (idf_vector[:, None] * w).astype(jnp.bfloat16).astype(jnp.float32)
    tf_bf = tf_vectors.astype(jnp.bfloat16).astype(jnp.float32)
    ref_bf16 = (tf_bf @ w_scaled_bf + b[None, :]).reshape(B, 1, d_model)
    np.testing.assert_allclose(np.asarray(features), np.asarray(ref_bf16),
                               rtol=1e-4, atol=1e-4)

    # Reference 2: full-precision f32 semantics (loose check, bf16-W storage error).
    ref_f32 = ((tf_vectors * idf_vector[None, :]) @ w + b[None, :]).reshape(
        B, 1, d_model)
    np.testing.assert_allclose(np.asarray(features), np.asarray(ref_f32),
                               rtol=5e-2, atol=5e-3)

    # Mask sanity: both texts are non-empty -> no padding.
    assert np.all(np.asarray(padding_mask) == 0.0)

    print("KERNEL_OK")
</pallas_src>

<mosaic_0001>
module attributes {stable_mosaic.version = 11 : i64} {
  func.func @tfidf_proj_kernel(%arg0: i32, %arg1: i32, %arg2: i32, %arg3: memref<8x128xf32, #tpu.memory_space<vmem>>, %arg4: memref<128x128xbf16, #tpu.memory_space<vmem>>, %arg5: memref<1x128xf32, #tpu.memory_space<vmem>>, %arg6: memref<8x128xf32, #tpu.memory_space<vmem>>) attributes {dimension_semantics = [#tpu.dimension_semantics<parallel>, #tpu.dimension_semantics<parallel>, #tpu.dimension_semantics<arbitrary>], iteration_bounds = array<i64: 1, 1, 1>, scalar_prefetch = 0 : i64, scratch_operands = 0 : i64, tpu.core_type = #tpu.core_type<tc>, window_params = [{transform_indices = @transform_0, window_bounds = array<i64: 8, 128>}, {transform_indices = @transform_1, window_bounds = array<i64: 128, 128>}, {transform_indices = @transform_2, window_bounds = array<i64: 1, 128>}, {transform_indices = @transform_3, window_bounds = array<i64: 8, 128>}]} {
    %c0_i32 = arith.constant 0 : i32
    %0 = arith.cmpi eq, %arg2, %c0_i32 : i32
    %1 = arith.extui %0 : i1 to i32
    %c0_i32_0 = arith.constant 0 : i32
    %2 = arith.cmpi ne, %1, %c0_i32_0 : i32
    scf.if %2 {
      %c0_8 = arith.constant 0 : index
      %c0_9 = arith.constant 0 : index
      %10 = vector.load %arg5[%c0_8, %c0_9] : memref<1x128xf32, #tpu.memory_space<vmem>>, vector<1x128xf32>
      %11 = vector.shape_cast %10 : vector<1x128xf32> to vector<1x128xf32>
      %12 = vector.broadcast %11 : vector<1x128xf32> to vector<8x128xf32>
      %c0_10 = arith.constant 0 : index
      %c0_11 = arith.constant 0 : index
      %13 = vector.load %arg6[%c0_10, %c0_11] : memref<8x128xf32, #tpu.memory_space<vmem>>, vector<8x128xf32>
      tpu.vector_store %arg6[%c0_10, %c0_11], %12 {strides = array<i32>} : memref<8x128xf32, #tpu.memory_space<vmem>>, vector<8x128xf32>,
    } else {
    }
    %c0 = arith.constant 0 : index
    %c0_1 = arith.constant 0 : index
    %3 = vector.load %arg6[%c0, %c0_1] : memref<8x128xf32, #tpu.memory_space<vmem>>, vector<8x128xf32>
    %c0_2 = arith.constant 0 : index
    %c0_3 = arith.constant 0 : index
    %4 = vector.load %arg3[%c0_2, %c0_3] : memref<8x128xf32, #tpu.memory_space<vmem>>, vector<8x128xf32>
    %5 = arith.truncf %4 : vector<8x128xf32> to vector<8x128xbf16>
    %c0_4 = arith.constant 0 : index
    %c0_5 = arith.constant 0 : index
    %6 = vector.load %arg4[%c0_4, %c0_5] : memref<128x128xbf16, #tpu.memory_space<vmem>>, vector<128x128xbf16>
    %cst = arith.constant dense<0.000000e+00> : vector<8x128xf32>
    %7 = tpu.matmul %5, %6, %cst {dimension_numbers = #tpu.dot_dimension_numbers<[1], [0], [0], [1], [0, 0, 1, 1], [], []>} : vector<8x128xbf16>, vector<128x128xbf16>, vector<8x128xf32> -> vector<8x128xf32>
    %8 = arith.addf %3, %7 : vector<8x128xf32>
    %c0_6 = arith.constant 0 : index
    %c0_7 = arith.constant 0 : index
    %9 = vector.load %arg6[%c0_6, %c0_7] : memref<8x128xf32, #tpu.memory_space<vmem>>, vector<8x128xf32>
    tpu.vector_store %arg6[%c0_6, %c0_7], %8 {strides = array<i32>} : memref<8x128xf32, #tpu.memory_space<vmem>>, vector<8x128xf32>,
    return
  }
  func.func @transform_0(%arg0: i32, %arg1: i32, %arg2: i32) -> (i32, i32) {
    %c0_i32 = arith.constant 0 : i32
    return %arg0, %arg2 : i32, i32
  }
  func.func @transform_1(%arg0: i32, %arg1: i32, %arg2: i32) -> (i32, i32) {
    %c0_i32 = arith.constant 0 : i32
    return %arg2, %arg1 : i32, i32
  }
  func.func @transform_2(%arg0: i32, %arg1: i32, %arg2: i32) -> (i32, i32) {
    %c0_i32 = arith.constant 0 : i32
    %c0_i32_0 = arith.constant 0 : i32
    return %c0_i32, %arg1 : i32, i32
  }
  func.func @transform_3(%arg0: i32, %arg1: i32, %arg2: i32) -> (i32, i32) {
    %c0_i32 = arith.constant 0 : i32
    return %arg0, %arg1 : i32, i32
  }
}

</mosaic_0001>

<bundles_post_ra>
// kernel: _apply.1
= control target key start
LH: loop header
LB: loop body
LE: loop exit
PB: predicated region body
PF: predicated region fallthrough
CT: control target
= control target key end

     0   :  { %8 = vsyncpa [#allocation3], 0  ;;  %s230_s12 = smov [#allocation2]   ;;  %s276_s0 = inlined_call_operand.vmem [shape: f32[8,128], index: 0, kind: input, shape index: {}]   ;;  %s277_s1 = inlined_call_operand.hbm [shape: bf16[128,128], index: 1, kind: input, shape index: {}]   ;;  %s278_s2 = inlined_call_operand.vmem [shape: f32[1,128], index: 2, kind: input, shape index: {}]   ;;  %s279_s3 = inlined_call_operand.vmem [shape: f32[8,128], index: 3, kind: output, shape index: {}]  }
   0x1   :  { %s16_s13 = sshll.u32 %s230_s12, 4  ;;  %s206_s16 = scalar_lea.hbm %s277_s1, 1024  ;;  %s17_s13 = int_to_ptr.vmem [resolvable:$true] %s16_s13 }
   0x2   :  { %p207_p0 = scmp.ne.s32.totalorder %s277_s1, %s206_s16  ;;  %p210_p1 = scmp.lt.u32.totalorder %s206_s16, %s277_s1 }
   0x4   :  { %p212_p2 = pnand %p210_p1, %p207_p0 }
   0x6   :  { %215 = shalt.err (!%p212_p2)
}
   0x7   :  { %s216_s21 = scalar_lea.vmem %s17_s13, 1024  ;;  %p221_p4 = scmp.lt.s32.totalorder %s17_s13, %s17_s13 }
   0x8   :  { %p217_p3 = scmp.ne.s32.totalorder %s17_s13, %s216_s21  ;;  %p222_p5 = scmp.lt.s32.totalorder %s216_s21, %s216_s21 }
   0xa   :  { %p223_p6 = por %p222_p5, %p221_p4 }
   0xc   :  { %p224_p7 = pnand %p223_p6, %p217_p3 }
   0xe   :  { %227 = shalt.err (!%p224_p7)
}
   0xf   :  { %s231_s22 = smov 64   ;;  %s232_s23 = smov 4  }
  0x10   :  { %22 = dma.hbm_to_vmem [thread:$0]  %s277_s1, 1024, %s17_s13, [#allocation3], %s231_s22, %s231_s22, %s232_s23  }
  0x11   :  { %228 = dma.done.wait [#allocation3], 1024  }
  0x12   :  { %229 = vsyncadd [#allocation3], 4294966272  ;;  %v233_v0 = vmov 0.0   ;;  %vm234_vm0 = vmmov 0   ;;  %v198_v1 = vld [vmem:[#allocation2] sm:$0xff]   ;;  %v199_v2 = vld [vmem:[#allocation2 + $0x8] sm:$0xff]  }
  0x13   :  { %173 = vmatprep.subr.bf16.mxu0 %v233_v0  ;;  %189 = vmatprep.mubr.msk.bf16.mxu0 %vm234_vm0, %v233_v0  ;;  %v200_v3 = vld [vmem:[#allocation2 + $0x10] sm:$0xff]   ;;  %v201_v4 = vld [vmem:[#allocation2 + $0x18] sm:$0xff]   ;;  %v202_v5 = vld [vmem:[#allocation2 + $0x20] sm:$0xff]  }
  0x14   :  { %174 = vmatpush3.bf16.msra.mxu0 %v198_v1  ;;  %v203_v6 = vld [vmem:[#allocation2 + $0x28] sm:$0xff]   ;;  %v204_v7 = vld [vmem:[#allocation2 + $0x30] sm:$0xff]   ;;  %v205_v8 = vld [vmem:[#allocation2 + $0x38] sm:$0xff]  }
  0x15   :  { %175 = vmatprep.subr.bf16.mxu0 %v233_v0  ;;  %v42_v9 = vld [vmem:[%s276_s0] sm:$0xff] }
  0x16   :  { %v43_v10 = vpack.c.bf16 %v42_v9, %v42_v9  ;;  %v155_v11 = vld [vmem:[%s278_s2] ss:$0 sm:$0xff] }
  0x18   :  { %176 = vmatpush3.bf16.msra.mxu0 %v199_v2 }
  0x19   :  { %177 = vmatprep.subr.bf16.mxu0 %v233_v0 }
  0x1c   :  { %178 = vmatpush3.bf16.msra.mxu0 %v200_v3 }
  0x1d   :  { %179 = vmatprep.subr.bf16.mxu0 %v233_v0 }
  0x20   :  { %180 = vmatpush3.bf16.msra.mxu0 %v201_v4 }
  0x21   :  { %181 = vmatprep.subr.bf16.mxu0 %v233_v0 }
  0x24   :  { %182 = vmatpush3.bf16.msra.mxu0 %v202_v5 }
  0x25   :  { %183 = vmatprep.subr.bf16.mxu0 %v233_v0 }
  0x28   :  { %184 = vmatpush3.bf16.msra.mxu0 %v203_v6 }
  0x29   :  { %185 = vmatprep.subr.bf16.mxu0 %v233_v0 }
  0x2c   :  { %186 = vmatpush3.bf16.msra.mxu0 %v204_v7 }
  0x2d   :  { %187 = vmatprep.subr.bf16.mxu0 %v233_v0 }
  0x30   :  { %188 = vmatpush3.bf16.msra.mxu0 %v205_v8 }
  0x33   :  { %190 = vmatmul.mubr.bf16.vlgmr.msra.gmra.mrb[0].mxu0 %v43_v10 }
 0x106   :  { %v142_v12 = vpop.f32.mrb[0].mxu0 }
 0x107   :  { %v148_v13 = vadd.f32 %v155_v11, %v142_v12  ;;  %v191_v14 = vpop.f32.mrb[1].mxu0 }
 0x108   :  { %v145_v15 = vpop.f32.mrb[2].mxu0 }
 0x109   :  { %149 = vst [vmem:[%s279_s3] sm:$0xff] %v148_v13  ;;  %v192_v16 = vpop.f32.mrb[3].mxu0 }
 0x10a   :  { %154 = vsyncpa [#allocation3], 1 }

</bundles_post_ra>
